<compile_context>
chip_gen: v7x
topology: tpu7x:2x2x1
jax: 0.10.0
libtpu: 0.0.40
codegen_flags: <defaults>
</compile_context>

<pallas_src>
import jax
import jax.numpy as jnp
from jax.experimental import pallas as pl
from jax.experimental.pallas import tpu as pltpu

INPUT_DIM = 35
HIDDEN_DIM = 30
SEQ_LEN = 8
BN_EPS = 1e-5


def _ru8(n):
    return (n + 7) // 8 * 8


# Packed-parameter slab row layout (width = HIDDEN_DIM, f32):
#   rows 0..7 : b1, g1, beta1, b2, g2, beta2, w_out(row), b_out(broadcast row)
#   then the four weight matrices, each 8-row aligned.
ROW_WIH1 = 8
ROW_WHH1 = ROW_WIH1 + _ru8(INPUT_DIM)
ROW_WIH2 = ROW_WHH1 + _ru8(HIDDEN_DIM)
ROW_WHH2 = ROW_WIH2 + _ru8(HIDDEN_DIM)
N_ROWS = ROW_WHH2 + _ru8(HIDDEN_DIM)


def pack_params(p):
    """Pack all parameters into one (N_ROWS, HIDDEN_DIM) f32 slab (host side)."""
    H = HIDDEN_DIM

    def pad_rows(a, rows):
        return jnp.pad(a, ((0, rows - a.shape[0]), (0, 0)))

    vec = jnp.concatenate(
        [p["b1"], p["g1"], p["beta1"], p["b2"], p["g2"], p["beta2"],
         p["wout_t"].reshape(1, H),
         jnp.broadcast_to(p["bout"], (1, H))],
        axis=0)                                     # (8, H)
    slab = jnp.concatenate(
        [vec,
         pad_rows(p["wih1_t"], _ru8(INPUT_DIM)),
         pad_rows(p["whh1_t"], _ru8(HIDDEN_DIM)),
         pad_rows(p["wih2_t"], _ru8(HIDDEN_DIM)),
         pad_rows(p["whh2_t"], _ru8(HIDDEN_DIM))],
        axis=0)                                     # (N_ROWS, H)
    assert slab.shape == (N_ROWS, H)
    return slab.astype(jnp.float32)


def thermo_kernel(x_ref, p_ref, out_ref):
    T = x_ref.shape[0]
    D = x_ref.shape[1]
    H = p_ref.shape[1]
    f32 = jnp.float32
    bf16 = jnp.bfloat16

    # ---- static sub-views of the single packed parameter slab (zero-cost) ----
    b1 = p_ref[0:1, :]
    g1 = p_ref[1:2, :]
    beta1 = p_ref[2:3, :]
    b2 = p_ref[3:4, :]
    g2 = p_ref[4:5, :]
    beta2 = p_ref[5:6, :]
    w_out = p_ref[6:7, :]
    b_out = p_ref[7:8, 0:1]
    wih1 = p_ref[ROW_WIH1:ROW_WIH1 + D, :].astype(bf16)
    whh1 = p_ref[ROW_WHH1:ROW_WHH1 + H, :].astype(bf16)
    wih2 = p_ref[ROW_WIH2:ROW_WIH2 + H, :].astype(bf16)
    whh2 = p_ref[ROW_WHH2:ROW_WHH2 + H, :].astype(bf16)

    def rnn(x_pre, whh_bf):
        # h_t = tanh(x_pre[t] + h_{t-1} @ W_hh^T); h_{-1} = 0 -> skip first dot.
        hs = [jnp.tanh(x_pre[0:1, :])]
        for t in range(1, T):                     # statically unrolled, T small
            hv = jnp.dot(hs[-1].astype(bf16), whh_bf,
                         preferred_element_type=f32)
            hs.append(jnp.tanh(x_pre[t:t + 1, :] + hv))
        return jnp.concatenate(hs, axis=0)        # (T, H), lives in vregs

    def bn_relu(y, g, beta):
        # BatchNorm1d training-mode stats over the sequence axis, biased var.
        mu = jnp.mean(y, axis=0, keepdims=True)
        var = jnp.mean((y - mu) * (y - mu), axis=0, keepdims=True)
        y = (y - mu) * jax.lax.rsqrt(var + BN_EPS) * g + beta
        return jnp.maximum(y, 0.0)

    # ---- RNN layer 1 + BN + ReLU ----
    xp1 = jnp.dot(x_ref[...].astype(bf16), wih1,
                  preferred_element_type=f32) + b1
    y1 = bn_relu(rnn(xp1, whh1), g1, beta1)

    # ---- RNN layer 2 + BN + ReLU ----
    xp2 = jnp.dot(y1.astype(bf16), wih2,
                  preferred_element_type=f32) + b2
    y2 = bn_relu(rnn(xp2, whh2), g2, beta2)

    # ---- Linear(hidden_dim, 1): VPU mul + lane reduction (f32) ----
    out_ref[...] = jnp.sum(y2 * w_out, axis=1, keepdims=True) + b_out


def thermo_rnn_forward(x, param_slab):
    T = x.shape[0]
    vmem = pl.BlockSpec(memory_space=pltpu.MemorySpace.VMEM)
    return pl.pallas_call(
        thermo_kernel,
        out_shape=jax.ShapeDtypeStruct((T, 1), jnp.float32),
        in_specs=[vmem, vmem],
        out_specs=vmem,
    )(x, param_slab)


def init_params(key, input_dim, hidden_dim):
    ks = jax.random.split(key, 10)
    s = 1.0 / float(hidden_dim) ** 0.5
    u = lambda k, shape: jax.random.uniform(k, shape, jnp.float32, -s, s)
    wih1 = u(ks[0], (hidden_dim, input_dim))
    whh1 = u(ks[1], (hidden_dim, hidden_dim))
    bih1 = u(ks[2], (hidden_dim,))
    bhh1 = u(ks[3], (hidden_dim,))
    wih2 = u(ks[4], (hidden_dim, hidden_dim))
    whh2 = u(ks[5], (hidden_dim, hidden_dim))
    bih2 = u(ks[6], (hidden_dim,))
    bhh2 = u(ks[7], (hidden_dim,))
    wout = u(ks[8], (1, hidden_dim))
    bout = u(ks[9], (1,))
    return {
        # pre-transposed (in, out) layouts; biases / BN params reshaped to 2-D
        "wih1_t": wih1.T, "whh1_t": whh1.T,
        "b1": (bih1 + bhh1).reshape(1, hidden_dim),
        "g1": jnp.ones((1, hidden_dim), jnp.float32),       # BN default weight
        "beta1": jnp.zeros((1, hidden_dim), jnp.float32),   # BN default bias
        "wih2_t": wih2.T, "whh2_t": whh2.T,
        "b2": (bih2 + bhh2).reshape(1, hidden_dim),
        "g2": jnp.ones((1, hidden_dim), jnp.float32),
        "beta2": jnp.zeros((1, hidden_dim), jnp.float32),
        "wout_t": wout.T, "bout": bout.reshape(1, 1),
    }


def thermo_ref(x, p):
    """Plain-JAX f32 reference of the PyTorch forward (sanity check)."""
    def rnn(xs, wih_t, whh_t, b):
        h0 = jnp.zeros((whh_t.shape[0],), jnp.float32)

        def step(h, xt):
            h = jnp.tanh(xt @ wih_t + b[0] + h @ whh_t)
            return h, h
        _, out = jax.lax.scan(step, h0, xs)
        return out

    def bn(y, g, b):
        mu = y.mean(0, keepdims=True)
        var = ((y - mu) ** 2).mean(0, keepdims=True)
        return (y - mu) / jnp.sqrt(var + BN_EPS) * g + b

    y = rnn(x, p["wih1_t"], p["whh1_t"], p["b1"])
    y = jnp.maximum(bn(y, p["g1"], p["beta1"]), 0.0)
    y = rnn(y, p["wih2_t"], p["whh2_t"], p["b2"])
    y = jnp.maximum(bn(y, p["g2"], p["beta2"]), 0.0)
    return y @ p["wout_t"] + p["bout"]


if __name__ == "__main__":
    key = jax.random.PRNGKey(0)
    kx, kp = jax.random.split(key)
    x = jax.random.normal(kx, (SEQ_LEN, INPUT_DIM), jnp.float32)
    params = init_params(kp, INPUT_DIM, HIDDEN_DIM)
    slab = pack_params(params)                 # one-time host-side packing

    out = thermo_rnn_forward(x, slab)
    out = jax.block_until_ready(out)

    ref = jax.block_until_ready(thermo_ref(x, params))
    assert out.shape == (SEQ_LEN, 1), out.shape
    # bf16 MXU operands (f32 accumulation) + two BN normalizations -> slightly
    # looser tolerance than pure-f32.
    assert jnp.allclose(out, ref, atol=3e-2, rtol=3e-2), (out, ref)

    print("KERNEL_OK")
</pallas_src>

<mosaic_0001>
module attributes {stable_mosaic.version = 11 : i64} {
  func.func @thermo_kernel(%arg0: memref<8x35xf32, #tpu.memory_space<vmem>>, %arg1: memref<144x30xf32, #tpu.memory_space<vmem>>, %arg2: memref<8x1xf32, #tpu.memory_space<vmem>>) attributes {dimension_semantics = [], scalar_prefetch = 0 : i64, scratch_operands = 0 : i64, tpu.core_type = #tpu.core_type<tc>} {
    %c0 = arith.constant 0 : index
    %c0_0 = arith.constant 0 : index
    %0 = vector.load %arg1[%c0, %c0_0] : memref<144x30xf32, #tpu.memory_space<vmem>>, vector<1x30xf32>
    %c1 = arith.constant 1 : index
    %c0_1 = arith.constant 0 : index
    %1 = vector.load %arg1[%c1, %c0_1] : memref<144x30xf32, #tpu.memory_space<vmem>>, vector<1x30xf32>
    %c2 = arith.constant 2 : index
    %c0_2 = arith.constant 0 : index
    %2 = vector.load %arg1[%c2, %c0_2] : memref<144x30xf32, #tpu.memory_space<vmem>>, vector<1x30xf32>
    %c3 = arith.constant 3 : index
    %c0_3 = arith.constant 0 : index
    %3 = vector.load %arg1[%c3, %c0_3] : memref<144x30xf32, #tpu.memory_space<vmem>>, vector<1x30xf32>
    %c4 = arith.constant 4 : index
    %c0_4 = arith.constant 0 : index
    %4 = vector.load %arg1[%c4, %c0_4] : memref<144x30xf32, #tpu.memory_space<vmem>>, vector<1x30xf32>
    %c5 = arith.constant 5 : index
    %c0_5 = arith.constant 0 : index
    %5 = vector.load %arg1[%c5, %c0_5] : memref<144x30xf32, #tpu.memory_space<vmem>>, vector<1x30xf32>
    %c6 = arith.constant 6 : index
    %c0_6 = arith.constant 0 : index
    %6 = vector.load %arg1[%c6, %c0_6] : memref<144x30xf32, #tpu.memory_space<vmem>>, vector<1x30xf32>
    %c7 = arith.constant 7 : index
    %c0_7 = arith.constant 0 : index
    %7 = vector.load %arg1[%c7, %c0_7] : memref<144x30xf32, #tpu.memory_space<vmem>>, vector<1x1xf32>
    %c8 = arith.constant 8 : index
    %c0_8 = arith.constant 0 : index
    %8 = vector.load %arg1[%c8, %c0_8] : memref<144x30xf32, #tpu.memory_space<vmem>>, vector<35x30xf32>
    %9 = arith.truncf %8 : vector<35x30xf32> to vector<35x30xbf16>
    %c48 = arith.constant 48 : index
    %c0_9 = arith.constant 0 : index
    %10 = vector.load %arg1[%c48, %c0_9] : memref<144x30xf32, #tpu.memory_space<vmem>>, vector<30x30xf32>
    %11 = arith.truncf %10 : vector<30x30xf32> to vector<30x30xbf16>
    %c80 = arith.constant 80 : index
    %c0_10 = arith.constant 0 : index
    %12 = vector.load %arg1[%c80, %c0_10] : memref<144x30xf32, #tpu.memory_space<vmem>>, vector<30x30xf32>
    %13 = arith.truncf %12 : vector<30x30xf32> to vector<30x30xbf16>
    %c112 = arith.constant 112 : index
    %c0_11 = arith.constant 0 : index
    %14 = vector.load %arg1[%c112, %c0_11] : memref<144x30xf32, #tpu.memory_space<vmem>>, vector<30x30xf32>
    %15 = arith.truncf %14 : vector<30x30xf32> to vector<30x30xbf16>
    %c0_12 = arith.constant 0 : index
    %c0_13 = arith.constant 0 : index
    %16 = vector.load %arg0[%c0_12, %c0_13] : memref<8x35xf32, #tpu.memory_space<vmem>>, vector<8x35xf32>
    %17 = arith.truncf %16 : vector<8x35xf32> to vector<8x35xbf16>
    %cst = arith.constant dense<0.000000e+00> : vector<8x30xf32>
    %18 = tpu.matmul %17, %9, %cst {dimension_numbers = #tpu.dot_dimension_numbers<[1], [0], [0], [1], [0, 0, 1, 1], [], []>} : vector<8x35xbf16>, vector<35x30xbf16>, vector<8x30xf32> -> vector<8x30xf32>
    %19 = vector.broadcast %0 : vector<1x30xf32> to vector<8x30xf32>
    %20 = arith.addf %18, %19 : vector<8x30xf32>
    %21 = vector.extract_strided_slice %20 {offsets = [0, 0], sizes = [1, 30], strides = [1, 1]} : vector<8x30xf32> to vector<1x30xf32>
    %22 = math.tanh %21 : vector<1x30xf32>
    %23 = arith.truncf %22 : vector<1x30xf32> to vector<1x30xbf16>
    %cst_14 = arith.constant dense<0.000000e+00> : vector<1x30xf32>
    %24 = tpu.matmul %23, %11, %cst_14 {dimension_numbers = #tpu.dot_dimension_numbers<[1], [0], [0], [1], [0, 0, 1, 1], [], []>} : vector<1x30xbf16>, vector<30x30xbf16>, vector<1x30xf32> -> vector<1x30xf32>
    %25 = vector.extract_strided_slice %20 {offsets = [1, 0], sizes = [1, 30], strides = [1, 1]} : vector<8x30xf32> to vector<1x30xf32>
    %26 = arith.addf %25, %24 : vector<1x30xf32>
    %27 = math.tanh %26 : vector<1x30xf32>
    %28 = arith.truncf %27 : vector<1x30xf32> to vector<1x30xbf16>
    %cst_15 = arith.constant dense<0.000000e+00> : vector<1x30xf32>
    %29 = tpu.matmul %28, %11, %cst_15 {dimension_numbers = #tpu.dot_dimension_numbers<[1], [0], [0], [1], [0, 0, 1, 1], [], []>} : vector<1x30xbf16>, vector<30x30xbf16>, vector<1x30xf32> -> vector<1x30xf32>
    %30 = vector.extract_strided_slice %20 {offsets = [2, 0], sizes = [1, 30], strides = [1, 1]} : vector<8x30xf32> to vector<1x30xf32>
    %31 = arith.addf %30, %29 : vector<1x30xf32>
    %32 = math.tanh %31 : vector<1x30xf32>
    %33 = arith.truncf %32 : vector<1x30xf32> to vector<1x30xbf16>
    %cst_16 = arith.constant dense<0.000000e+00> : vector<1x30xf32>
    %34 = tpu.matmul %33, %11, %cst_16 {dimension_numbers = #tpu.dot_dimension_numbers<[1], [0], [0], [1], [0, 0, 1, 1], [], []>} : vector<1x30xbf16>, vector<30x30xbf16>, vector<1x30xf32> -> vector<1x30xf32>
    %35 = vector.extract_strided_slice %20 {offsets = [3, 0], sizes = [1, 30], strides = [1, 1]} : vector<8x30xf32> to vector<1x30xf32>
    %36 = arith.addf %35, %34 : vector<1x30xf32>
    %37 = math.tanh %36 : vector<1x30xf32>
    %38 = arith.truncf %37 : vector<1x30xf32> to vector<1x30xbf16>
    %cst_17 = arith.constant dense<0.000000e+00> : vector<1x30xf32>
    %39 = tpu.matmul %38, %11, %cst_17 {dimension_numbers = #tpu.dot_dimension_numbers<[1], [0], [0], [1], [0, 0, 1, 1], [], []>} : vector<1x30xbf16>, vector<30x30xbf16>, vector<1x30xf32> -> vector<1x30xf32>
    %40 = vector.extract_strided_slice %20 {offsets = [4, 0], sizes = [1, 30], strides = [1, 1]} : vector<8x30xf32> to vector<1x30xf32>
    %41 = arith.addf %40, %39 : vector<1x30xf32>
    %42 = math.tanh %41 : vector<1x30xf32>
    %43 = arith.truncf %42 : vector<1x30xf32> to vector<1x30xbf16>
    %cst_18 = arith.constant dense<0.000000e+00> : vector<1x30xf32>
    %44 = tpu.matmul %43, %11, %cst_18 {dimension_numbers = #tpu.dot_dimension_numbers<[1], [0], [0], [1], [0, 0, 1, 1], [], []>} : vector<1x30xbf16>, vector<30x30xbf16>, vector<1x30xf32> -> vector<1x30xf32>
    %45 = vector.extract_strided_slice %20 {offsets = [5, 0], sizes = [1, 30], strides = [1, 1]} : vector<8x30xf32> to vector<1x30xf32>
    %46 = arith.addf %45, %44 : vector<1x30xf32>
    %47 = math.tanh %46 : vector<1x30xf32>
    %48 = arith.truncf %47 : vector<1x30xf32> to vector<1x30xbf16>
    %cst_19 = arith.constant dense<0.000000e+00> : vector<1x30xf32>
    %49 = tpu.matmul %48, %11, %cst_19 {dimension_numbers = #tpu.dot_dimension_numbers<[1], [0], [0], [1], [0, 0, 1, 1], [], []>} : vector<1x30xbf16>, vector<30x30xbf16>, vector<1x30xf32> -> vector<1x30xf32>
    %50 = vector.extract_strided_slice %20 {offsets = [6, 0], sizes = [1, 30], strides = [1, 1]} : vector<8x30xf32> to vector<1x30xf32>
    %51 = arith.addf %50, %49 : vector<1x30xf32>
    %52 = math.tanh %51 : vector<1x30xf32>
    %53 = arith.truncf %52 : vector<1x30xf32> to vector<1x30xbf16>
    %cst_20 = arith.constant dense<0.000000e+00> : vector<1x30xf32>
    %54 = tpu.matmul %53, %11, %cst_20 {dimension_numbers = #tpu.dot_dimension_numbers<[1], [0], [0], [1], [0, 0, 1, 1], [], []>} : vector<1x30xbf16>, vector<30x30xbf16>, vector<1x30xf32> -> vector<1x30xf32>
    %55 = vector.extract_strided_slice %20 {offsets = [7, 0], sizes = [1, 30], strides = [1, 1]} : vector<8x30xf32> to vector<1x30xf32>
    %56 = arith.addf %55, %54 : vector<1x30xf32>
    %57 = math.tanh %56 : vector<1x30xf32>
    %58 = tpu.concatenate %22, %27, %32, %37, %42, %47, %52, %57 in 0 : vector<1x30xf32>, vector<1x30xf32>, vector<1x30xf32>, vector<1x30xf32>, vector<1x30xf32>, vector<1x30xf32>, vector<1x30xf32>, vector<1x30xf32> -> vector<8x30xf32>
    %cst_21 = arith.constant dense<0.000000e+00> : vector<30xf32>
    %59 = vector.multi_reduction <add>, %58, %cst_21 [0] : vector<8x30xf32> to vector<30xf32>
    %60 = vector.shape_cast %59 : vector<30xf32> to vector<1x30xf32>
    %cst_22 = arith.constant 8.000000e+00 : f32
    %61 = vector.broadcast %cst_22 : f32 to vector<1x30xf32>
    %62 = arith.divf %60, %61 : vector<1x30xf32>
    %63 = vector.broadcast %62 : vector<1x30xf32> to vector<8x30xf32>
    %64 = arith.subf %58, %63 : vector<8x30xf32>
    %65 = vector.broadcast %62 : vector<1x30xf32> to vector<8x30xf32>
    %66 = arith.subf %58, %65 : vector<8x30xf32>
    %67 = arith.mulf %64, %66 : vector<8x30xf32>
    %cst_23 = arith.constant dense<0.000000e+00> : vector<30xf32>
    %68 = vector.multi_reduction <add>, %67, %cst_23 [0] : vector<8x30xf32> to vector<30xf32>
    %69 = vector.shape_cast %68 : vector<30xf32> to vector<1x30xf32>
    %cst_24 = arith.constant 8.000000e+00 : f32
    %70 = vector.broadcast %cst_24 : f32 to vector<1x30xf32>
    %71 = arith.divf %69, %70 : vector<1x30xf32>
    %72 = vector.broadcast %62 : vector<1x30xf32> to vector<8x30xf32>
    %73 = arith.subf %58, %72 : vector<8x30xf32>
    %cst_25 = arith.constant 9.99999974E-6 : f32
    %74 = vector.broadcast %cst_25 : f32 to vector<1x30xf32>
    %75 = arith.addf %71, %74 : vector<1x30xf32>
    %76 = math.rsqrt %75 : vector<1x30xf32>
    %77 = vector.broadcast %76 : vector<1x30xf32> to vector<8x30xf32>
    %78 = arith.mulf %73, %77 : vector<8x30xf32>
    %79 = vector.broadcast %1 : vector<1x30xf32> to vector<8x30xf32>
    %80 = arith.mulf %78, %79 : vector<8x30xf32>
    %81 = vector.broadcast %2 : vector<1x30xf32> to vector<8x30xf32>
    %82 = arith.addf %80, %81 : vector<8x30xf32>
    %cst_26 = arith.constant 0.000000e+00 : f32
    %83 = vector.broadcast %cst_26 : f32 to vector<8x30xf32>
    %84 = arith.maximumf %82, %83 : vector<8x30xf32>
    %85 = arith.truncf %84 : vector<8x30xf32> to vector<8x30xbf16>
    %cst_27 = arith.constant dense<0.000000e+00> : vector<8x30xf32>
    %86 = tpu.matmul %85, %13, %cst_27 {dimension_numbers = #tpu.dot_dimension_numbers<[1], [0], [0], [1], [0, 0, 1, 1], [], []>} : vector<8x30xbf16>, vector<30x30xbf16>, vector<8x30xf32> -> vector<8x30xf32>
    %87 = vector.broadcast %3 : vector<1x30xf32> to vector<8x30xf32>
    %88 = arith.addf %86, %87 : vector<8x30xf32>
    %89 = vector.extract_strided_slice %88 {offsets = [0, 0], sizes = [1, 30], strides = [1, 1]} : vector<8x30xf32> to vector<1x30xf32>
    %90 = math.tanh %89 : vector<1x30xf32>
    %91 = arith.truncf %90 : vector<1x30xf32> to vector<1x30xbf16>
    %cst_28 = arith.constant dense<0.000000e+00> : vector<1x30xf32>
    %92 = tpu.matmul %91, %15, %cst_28 {dimension_numbers = #tpu.dot_dimension_numbers<[1], [0], [0], [1], [0, 0, 1, 1], [], []>} : vector<1x30xbf16>, vector<30x30xbf16>, vector<1x30xf32> -> vector<1x30xf32>
    %93 = vector.extract_strided_slice %88 {offsets = [1, 0], sizes = [1, 30], strides = [1, 1]} : vector<8x30xf32> to vector<1x30xf32>
    %94 = arith.addf %93, %92 : vector<1x30xf32>
    %95 = math.tanh %94 : vector<1x30xf32>
    %96 = arith.truncf %95 : vector<1x30xf32> to vector<1x30xbf16>
    %cst_29 = arith.constant dense<0.000000e+00> : vector<1x30xf32>
    %97 = tpu.matmul %96, %15, %cst_29 {dimension_numbers = #tpu.dot_dimension_numbers<[1], [0], [0], [1], [0, 0, 1, 1], [], []>} : vector<1x30xbf16>, vector<30x30xbf16>, vector<1x30xf32> -> vector<1x30xf32>
    %98 = vector.extract_strided_slice %88 {offsets = [2, 0], sizes = [1, 30], strides = [1, 1]} : vector<8x30xf32> to vector<1x30xf32>
    %99 = arith.addf %98, %97 : vector<1x30xf32>
    %100 = math.tanh %99 : vector<1x30xf32>
    %101 = arith.truncf %100 : vector<1x30xf32> to vector<1x30xbf16>
    %cst_30 = arith.constant dense<0.000000e+00> : vector<1x30xf32>
    %102 = tpu.matmul %101, %15, %cst_30 {dimension_numbers = #tpu.dot_dimension_numbers<[1], [0], [0], [1], [0, 0, 1, 1], [], []>} : vector<1x30xbf16>, vector<30x30xbf16>, vector<1x30xf32> -> vector<1x30xf32>
    %103 = vector.extract_strided_slice %88 {offsets = [3, 0], sizes = [1, 30], strides = [1, 1]} : vector<8x30xf32> to vector<1x30xf32>
    %104 = arith.addf %103, %102 : vector<1x30xf32>
    %105 = math.tanh %104 : vector<1x30xf32>
    %106 = arith.truncf %105 : vector<1x30xf32> to vector<1x30xbf16>
    %cst_31 = arith.constant dense<0.000000e+00> : vector<1x30xf32>
    %107 = tpu.matmul %106, %15, %cst_31 {dimension_numbers = #tpu.dot_dimension_numbers<[1], [0], [0], [1], [0, 0, 1, 1], [], []>} : vector<1x30xbf16>, vector<30x30xbf16>, vector<1x30xf32> -> vector<1x30xf32>
    %108 = vector.extract_strided_slice %88 {offsets = [4, 0], sizes = [1, 30], strides = [1, 1]} : vector<8x30xf32> to vector<1x30xf32>
    %109 = arith.addf %108, %107 : vector<1x30xf32>
    %110 = math.tanh %109 : vector<1x30xf32>
    %111 = arith.truncf %110 : vector<1x30xf32> to vector<1x30xbf16>
    %cst_32 = arith.constant dense<0.000000e+00> : vector<1x30xf32>
    %112 = tpu.matmul %111, %15, %cst_32 {dimension_numbers = #tpu.dot_dimension_numbers<[1], [0], [0], [1], [0, 0, 1, 1], [], []>} : vector<1x30xbf16>, vector<30x30xbf16>, vector<1x30xf32> -> vector<1x30xf32>
    %113 = vector.extract_strided_slice %88 {offsets = [5, 0], sizes = [1, 30], strides = [1, 1]} : vector<8x30xf32> to vector<1x30xf32>
    %114 = arith.addf %113, %112 : vector<1x30xf32>
    %115 = math.tanh %114 : vector<1x30xf32>
    %116 = arith.truncf %115 : vector<1x30xf32> to vector<1x30xbf16>
    %cst_33 = arith.constant dense<0.000000e+00> : vector<1x30xf32>
    %117 = tpu.matmul %116, %15, %cst_33 {dimension_numbers = #tpu.dot_dimension_numbers<[1], [0], [0], [1], [0, 0, 1, 1], [], []>} : vector<1x30xbf16>, vector<30x30xbf16>, vector<1x30xf32> -> vector<1x30xf32>
    %118 = vector.extract_strided_slice %88 {offsets = [6, 0], sizes = [1, 30], strides = [1, 1]} : vector<8x30xf32> to vector<1x30xf32>
    %119 = arith.addf %118, %117 : vector<1x30xf32>
    %120 = math.tanh %119 : vector<1x30xf32>
    %121 = arith.truncf %120 : vector<1x30xf32> to vector<1x30xbf16>
    %cst_34 = arith.constant dense<0.000000e+00> : vector<1x30xf32>
    %122 = tpu.matmul %121, %15, %cst_34 {dimension_numbers = #tpu.dot_dimension_numbers<[1], [0], [0], [1], [0, 0, 1, 1], [], []>} : vector<1x30xbf16>, vector<30x30xbf16>, vector<1x30xf32> -> vector<1x30xf32>
    %123 = vector.extract_strided_slice %88 {offsets = [7, 0], sizes = [1, 30], strides = [1, 1]} : vector<8x30xf32> to vector<1x30xf32>
    %124 = arith.addf %123, %122 : vector<1x30xf32>
    %125 = math.tanh %124 : vector<1x30xf32>
    %126 = tpu.concatenate %90, %95, %100, %105, %110, %115, %120, %125 in 0 : vector<1x30xf32>, vector<1x30xf32>, vector<1x30xf32>, vector<1x30xf32>, vector<1x30xf32>, vector<1x30xf32>, vector<1x30xf32>, vector<1x30xf32> -> vector<8x30xf32>
    %cst_35 = arith.constant dense<0.000000e+00> : vector<30xf32>
    %127 = vector.multi_reduction <add>, %126, %cst_35 [0] : vector<8x30xf32> to vector<30xf32>
    %128 = vector.shape_cast %127 : vector<30xf32> to vector<1x30xf32>
    %cst_36 = arith.constant 8.000000e+00 : f32
    %129 = vector.broadcast %cst_36 : f32 to vector<1x30xf32>
    %130 = arith.divf %128, %129 : vector<1x30xf32>
    %131 = vector.broadcast %130 : vector<1x30xf32> to vector<8x30xf32>
    %132 = arith.subf %126, %131 : vector<8x30xf32>
    %133 = vector.broadcast %130 : vector<1x30xf32> to vector<8x30xf32>
    %134 = arith.subf %126, %133 : vector<8x30xf32>
    %135 = arith.mulf %132, %134 : vector<8x30xf32>
    %cst_37 = arith.constant dense<0.000000e+00> : vector<30xf32>
    %136 = vector.multi_reduction <add>, %135, %cst_37 [0] : vector<8x30xf32> to vector<30xf32>
    %137 = vector.shape_cast %136 : vector<30xf32> to vector<1x30xf32>
    %cst_38 = arith.constant 8.000000e+00 : f32
    %138 = vector.broadcast %cst_38 : f32 to vector<1x30xf32>
    %139 = arith.divf %137, %138 : vector<1x30xf32>
    %140 = vector.broadcast %130 : vector<1x30xf32> to vector<8x30xf32>
    %141 = arith.subf %126, %140 : vector<8x30xf32>
    %cst_39 = arith.constant 9.99999974E-6 : f32
    %142 = vector.broadcast %cst_39 : f32 to vector<1x30xf32>
    %143 = arith.addf %139, %142 : vector<1x30xf32>
    %144 = math.rsqrt %143 : vector<1x30xf32>
    %145 = vector.broadcast %144 : vector<1x30xf32> to vector<8x30xf32>
    %146 = arith.mulf %141, %145 : vector<8x30xf32>
    %147 = vector.broadcast %4 : vector<1x30xf32> to vector<8x30xf32>
    %148 = arith.mulf %146, %147 : vector<8x30xf32>
    %149 = vector.broadcast %5 : vector<1x30xf32> to vector<8x30xf32>
    %150 = arith.addf %148, %149 : vector<8x30xf32>
    %cst_40 = arith.constant 0.000000e+00 : f32
    %151 = vector.broadcast %cst_40 : f32 to vector<8x30xf32>
    %152 = arith.maximumf %150, %151 : vector<8x30xf32>
    %153 = vector.broadcast %6 : vector<1x30xf32> to vector<8x30xf32>
    %154 = arith.mulf %152, %153 : vector<8x30xf32>
    %cst_41 = arith.constant dense<0.000000e+00> : vector<8xf32>
    %155 = vector.multi_reduction <add>, %154, %cst_41 [1] : vector<8x30xf32> to vector<8xf32>
    %156 = vector.shape_cast %155 : vector<8xf32> to vector<8x1xf32>
    %157 = vector.broadcast %7 : vector<1x1xf32> to vector<8x1xf32>
    %158 = arith.addf %156, %157 : vector<8x1xf32>
    %c0_42 = arith.constant 0 : index
    %c0_43 = arith.constant 0 : index
    %159 = vector.load %arg2[%c0_42, %c0_43] : memref<8x1xf32, #tpu.memory_space<vmem>>, vector<8x1xf32>
    tpu.vector_store %arg2[%c0_42, %c0_43], %158 {strides = array<i32>} : memref<8x1xf32, #tpu.memory_space<vmem>>, vector<8x1xf32>,
    return
  }
}

</mosaic_0001>

<bundles_post_ra>
// kernel: tpu_custom_call.1
= control target key start
LH: loop header
LB: loop body
LE: loop exit
PB: predicated region body
PF: predicated region fallthrough
CT: control target
= control target key end

     0   :  { %vm56_vm0 = vcmask 1040384   ;;  %v1228_v0 = vmov 0.0   ;;  %vm57_vm1 = vcmask 1041408   ;;  %v1229_v7 = vmov 65535   ;;  %s1487_s1 = inlined_call_operand.vmem [shape: f32[144,30], index: 1, kind: input, shape index: {}]   ;;  %s1488_s0 = inlined_call_operand.vmem [shape: f32[8,35], index: 0, kind: input, shape index: {}]   ;;  %s1489_s2 = inlined_call_operand.vmem [shape: f32[8,1], index: 2, kind: output, shape index: {}]  }
   0x1   :  { %1059 = vmatprep.subr.bf16.mxu0 %v1228_v0  ;;  %v20_v1 = vld [vmem:[%s1487_s1 + $0x8] sm:$0xff]  ;;  %v21_v2 = vld [vmem:[%s1487_s1 + $0x10] sm:$0xff]  ;;  %v22_v3 = vld [vmem:[%s1487_s1 + $0x18] sm:$0xff]  ;;  %1069 = vmatprep.subr.bf16.mxu1 %v1228_v0  ;;  %v58_v8 = vsel %vm56_vm0, 4294967295, %v1229_v7  ;;  %vm1230_vm2 = vmmov 0   ;;  %vm52_vm3 = vcmask 285696  }
   0x2   :  { %v25_v4 = vpack.c.bf16 %v21_v2, %v20_v1  ;;  %v23_v5 = vld [vmem:[%s1487_s1 + $0x20] sm:$0xff]  ;;  %v24_v6 = vld [vmem:[%s1487_s1 + $0x28] sm:$0x7]  ;;  %1065 = vmatprep.mubr.msk.bf16.mxu0 %vm1230_vm2, %v1228_v0  ;;  %1073 = vmatprep.mubr.msk.bf16.mxu1 %vm1230_vm2, %v1228_v0  ;;  %v59_v11 = vsel %vm57_vm1, %v58_v8, 0  ;;  %v28_v15 = vld [vmem:[%s1487_s1 + $0x30] sm:$0xff]  ;;  %vm109_vm4 = vcmask 1046528  }
   0x3   :  { %v26_v9 = vpack.c.bf16 %v23_v5, %v22_v3  ;;  %v27_v10 = vpack.c.bf16 %v24_v6, %v24_v6  ;;  %v46_v13 = vld [vmem:[%s1488_s0] sm:$0xff]  ;;  %v29_v16 = vld [vmem:[%s1487_s1 + $0x38] sm:$0xff]  ;;  %v31_v19 = vld [vmem:[%s1487_s1 + $0x48] sm:$0x3f]  ;;  %vm105_vm5 = vcmask 244736   ;;  %vm471_vm6 = vcmask 1042432  }
   0x4   :  { %1060 = vmatpush3.bf16.msra.mxu0 %v25_v4  ;;  %v47_v14 = vpack.c.bf16 %v46_v13, %v46_v13  ;;  %v30_v17 = vld [vmem:[%s1487_s1 + $0x40] sm:$0xff]  ;;  %v1286_v18 = vpack.c.bf16 %v29_v16, %v28_v15  ;;  %vm473_vm7 = vcmask 1043456   ;;  %vm475_vm8 = vcmask 1044480  }
   0x5   :  { %1061 = vmatprep.subr.bf16.mxu0 %v1228_v0  ;;  %v61_v12 = vand.u32 %v59_v11, %v27_v10  ;;  %v33_v20 = vpack.c.bf16 %v31_v19, %v30_v17  ;;  %v986_v22 = vld [vmem:[%s1487_s1] ss:$0 sm:$0xff]  ;;  %vm477_vm9 = vcmask 1045504   ;;  %vm980_vm10 = vcmask 7168  }
   0x6   :  { %1070 = vmatpush3.bf16.msra.mxu1 %v1286_v18 }
   0x7   :  { %1071 = vmatprep.subr.bf16.mxu1 %v1228_v0  ;;  %v1295_v21 = vsel %vm109_vm4, %v33_v20, 0 }
   0x8   :  { %1062 = vmatpush3.bf16.msra.mxu0 %v26_v9 }
   0x9   :  { %1063 = vmatprep.subr.bf16.mxu0 %v1228_v0 }
   0xa   :  { %1072 = vmatpush3.bf16.msra.mxu1 %v1295_v21 }
   0xb   :  { %1077 = vmatprep.subr.bf16.mxu1 %v1228_v0 }
   0xc   :  { %1064 = vmatpush3.bf16.msra.mxu0 %v61_v12 }
   0xd   :  { %1085 = vmatprep.subr.bf16.mxu0 %v1228_v0 }
   0xf   :  { %1066 = vmatmul.mubr.msk.bf16.vlgmr.msra.gmra.mrb[0].mxu0 %vm52_vm3, %v47_v14 }
  0x10   :  { %1089 = vmatprep.mubr.msk.bf16.mxu0 %vm1230_vm2, %v1228_v0  ;;  %1086 = vmatpush3.bf16.msra.mxu0 %v1286_v18 }
  0x11   :  { %1087 = vmatprep.subr.bf16.mxu0 %v1228_v0 }
  0x14   :  { %1088 = vmatpush3.bf16.msra.mxu0 %v1295_v21 }
  0x15   :  { %1101 = vmatprep.subr.bf16.mxu0 %v1228_v0 }
  0xe2   :  { %v97_v23 = vpop.f32.mrb[0].mxu0 }
  0xe3   :  { %v1305_v24 = vadd.f32 %v986_v22, %v97_v23  ;;  %v1067_v25 = vpop.f32.mrb[1].mxu0 }
  0xe4   :  { %v100_v26 = vpop.f32.mrb[2].mxu0 }
  0xe5   :  { %v1068_v27 = vpop.f32.mrb[3].mxu0  ;;  %1192 = vtanh.f32 %v1305_v24 }
  0xef   :  { %v1193_v28 = vpop.eup %1192 }
  0xf0   :  { %v104_v29 = vpack.c.bf16 %v1193_v28, %v1193_v28 }
  0xf2   :  { %1074 = vmatmul.mubr.msk.bf16.vlgmr.msra.gmra.mrb[0].mxu1 %vm105_vm5, %v104_v29 }
  0xf3   :  { %1078 = vmatpush3.bf16.msra.mxu1 %v1286_v18  ;;  %1081 = vmatprep.mubr.msk.bf16.mxu1 %vm1230_vm2, %v1228_v0 }
  0xf4   :  { %1079 = vmatprep.subr.bf16.mxu1 %v1228_v0 }
  0xf7   :  { %1080 = vmatpush3.bf16.msra.mxu1 %v1295_v21 }
  0xf8   :  { %1093 = vmatprep.subr.bf16.mxu1 %v1228_v0 }
 0x1c5   :  { %v147_v30 = vpop.f32.mrb[0].mxu1 }
 0x1c6   :  { %v154_v31 = vrot.slane %v147_v30, 7  ;;  %v1075_v32 = vpop.f32.mrb[1].mxu1  ;;  %v34_v30 = vld [vmem:[%s1487_s1 + $0x50] sm:$0xff] }
 0x1c7   :  { %v150_v33 = vpop.f32.mrb[2].mxu1  ;;  %v36_v32 = vld [vmem:[%s1487_s1 + $0x60] sm:$0xff] }
 0x1c8   :  { %v156_v34 = vadd.f32 %v154_v31, %v1305_v24  ;;  %v1076_v35 = vpop.f32.mrb[3].mxu1  ;;  %v35_v31 = vld [vmem:[%s1487_s1 + $0x58] sm:$0xff] }
 0x1c9   :  { %v38_v33 = vpack.c.bf16 %v35_v31, %v34_v30 }
 0x1ca   :  { %1194 = vtanh.f32 %v156_v34  ;;  %v37_v34 = vld [vmem:[%s1487_s1 + $0x68] sm:$0x3f] }
 0x1cb   :  { %v39_v35 = vpack.c.bf16 %v37_v34, %v36_v32 }
 0x1d4   :  { %v1195_v36 = vpop.eup %1194 }
 0x1d5   :  { %v158_v37 = vpack.c.bf16 %v1195_v36, %v1195_v36  ;;  %v469_v46 = vsel %vm56_vm0, %v1193_v28, %v1195_v36  ;;  %v522_v36 = vsel %vm109_vm4, %v39_v35, 0 }
 0x1d7   :  { %v160_v38 = vshrl.u32 %v158_v37, 16 }
 0x1d9   :  { %1082 = vmatmul.mubr.msk.bf16.vlgmr.msra.gmra.mrb[4].mxu1 %vm105_vm5, %v160_v38 }
 0x1da   :  { %1094 = vmatpush3.bf16.msra.mxu1 %v1286_v18  ;;  %1097 = vmatprep.mubr.msk.bf16.mxu1 %vm1230_vm2, %v1228_v0 }
 0x1db   :  { %1095 = vmatprep.subr.bf16.mxu1 %v1228_v0 }
 0x1de   :  { %1096 = vmatpush3.bf16.msra.mxu1 %v1295_v21 }
 0x1df   :  { %1109 = vmatprep.subr.bf16.mxu1 %v1228_v0 }
 0x2ac   :  { %v199_v39 = vpop.f32.mrb[4].mxu1 }
 0x2ad   :  { %v206_v40 = vrot.slane %v199_v39, 6  ;;  %v1083_v41 = vpop.f32.mrb[5].mxu1 }
 0x2ae   :  { %v202_v42 = vpop.f32.mrb[6].mxu1 }
 0x2af   :  { %v208_v43 = vadd.f32 %v206_v40, %v1305_v24  ;;  %v1084_v44 = vpop.f32.mrb[7].mxu1 }
 0x2b1   :  { %1196 = vtanh.f32 %v208_v43 }
 0x2bb   :  { %v1197_v45 = vpop.eup %1196 }
 0x2bc   :  { %v470_v47 = vsel %vm57_vm1, %v469_v46, %v1197_v45  ;;  %v210_v48 = vpack.c.bf16 %v1197_v45, %v1197_v45 }
 0x2be   :  { %v212_v49 = vrot.slane %v210_v48, 1 }
 0x2c0   :  { %1090 = vmatmul.mubr.msk.bf16.vlgmr.msra.gmra.mrb[4].mxu0 %vm105_vm5, %v212_v49 }
 0x2c1   :  { %1102 = vmatpush3.bf16.msra.mxu0 %v1286_v18  ;;  %1105 = vmatprep.mubr.msk.bf16.mxu0 %vm1230_vm2, %v1228_v0 }
 0x2c2   :  { %1103 = vmatprep.subr.bf16.mxu0 %v1228_v0 }
 0x2c5   :  { %1104 = vmatpush3.bf16.msra.mxu0 %v1295_v21 }
 0x2c6   :  { %1117 = vmatprep.subr.bf16.mxu0 %v1228_v0 }
 0x393   :  { %v250_v50 = vpop.f32.mrb[4].mxu0 }
 0x394   :  { %v257_v51 = vrot.slane %v250_v50, 5  ;;  %v1091_v52 = vpop.f32.mrb[5].mxu0 }
 0x395   :  { %v253_v53 = vpop.f32.mrb[6].mxu0 }
 0x396   :  { %v259_v54 = vadd.f32 %v257_v51, %v1305_v24  ;;  %v1092_v55 = vpop.f32.mrb[7].mxu0 }
 0x398   :  { %1198 = vtanh.f32 %v259_v54 }
 0x3a2   :  { %v1199_v56 = vpop.eup %1198 }
 0x3a3   :  { %v472_v57 = vsel %vm471_vm6, %v470_v47, %v1199_v56  ;;  %v261_v58 = vpack.c.bf16 %v1199_v56, %v1199_v56 }
 0x3a5   :  { %v263_v59 = vshrl.u32 %v261_v58, 16 }
 0x3a7   :  { %v265_v60 = vrot.slane %v263_v59, 1 }
 0x3a9   :  { %1098 = vmatmul.mubr.msk.bf16.vlgmr.msra.gmra.mrb[8].mxu1 %vm105_vm5, %v265_v60 }
 0x3aa   :  { %1110 = vmatpush3.bf16.msra.mxu1 %v1286_v18  ;;  %1113 = vmatprep.mubr.msk.bf16.mxu1 %vm1230_vm2, %v1228_v0 }
 0x3ab   :  { %1111 = vmatprep.subr.bf16.mxu1 %v1228_v0 }
 0x3ae   :  { %1112 = vmatpush3.bf16.msra.mxu1 %v1295_v21 }
 0x3af   :  { %1125 = vmatprep.subr.bf16.mxu1 %v1228_v0 }
 0x47c   :  { %v303_v61 = vpop.f32.mrb[8].mxu1 }
 0x47d   :  { %v310_v62 = vrot.slane %v303_v61, 4  ;;  %v1099_v63 = vpop.f32.mrb[9].mxu1 }
 0x47e   :  { %v306_v1 = vpop.f32.mrb[10].mxu1 }
 0x47f   :  { %v312_v2 = vadd.f32 %v310_v62, %v1305_v24  ;;  %v1100_v3 = vpop.f32.mrb[11].mxu1  ;;  %v995_v1 = vld [vmem:[%s1487_s1 + $0x1] ss:$0 sm:$0xff] }
 0x480   :  { %v996_v3 = vld [vmem:[%s1487_s1 + $0x2] ss:$0 sm:$0xff] }
 0x481   :  { %1200 = vtanh.f32 %v312_v2 }
 0x48b   :  { %v1201_v4 = vpop.eup %1200 }
 0x48c   :  { %v314_v5 = vpack.c.bf16 %v1201_v4, %v1201_v4  ;;  %v474_v6 = vsel %vm473_vm7, %v472_v57, %v1201_v4 }
 0x48e   :  { %v316_v7 = vrot.slane %v314_v5, 2 }
 0x490   :  { %1106 = vmatmul.mubr.msk.bf16.vlgmr.msra.gmra.mrb[8].mxu0 %vm105_vm5, %v316_v7 }
 0x491   :  { %1118 = vmatpush3.bf16.msra.mxu0 %v1286_v18  ;;  %1121 = vmatprep.mubr.msk.bf16.mxu0 %vm1230_vm2, %v1228_v0 }
 0x492   :  { %1119 = vmatprep.subr.bf16.mxu0 %v1228_v0 }
 0x495   :  { %1120 = vmatpush3.bf16.msra.mxu0 %v1295_v21 }
 0x496   :  { %1133 = vmatprep.subr.bf16.mxu0 %v1228_v0 }
 0x563   :  { %v354_v8 = vpop.f32.mrb[8].mxu0 }
 0x564   :  { %v361_v9 = vrot.slane %v354_v8, 3  ;;  %v1107_v10 = vpop.f32.mrb[9].mxu0  ;;  %v40_v8 = vld [vmem:[%s1487_s1 + $0x70] sm:$0xff] }
 0x565   :  { %v357_v11 = vpop.f32.mrb[10].mxu0  ;;  %v42_v10 = vld [vmem:[%s1487_s1 + $0x80] sm:$0xff] }
 0x566   :  { %v363_v12 = vadd.f32 %v361_v9, %v1305_v24  ;;  %v1108_v13 = vpop.f32.mrb[11].mxu0  ;;  %v41_v9 = vld [vmem:[%s1487_s1 + $0x78] sm:$0xff] }
 0x567   :  { %v1398_v11 = vpack.c.bf16 %v41_v9, %v40_v8 }
 0x568   :  { %1202 = vtanh.f32 %v363_v12  ;;  %v43_v12 = vld [vmem:[%s1487_s1 + $0x88] sm:$0x3f] }
 0x569   :  { %v45_v13 = vpack.c.bf16 %v43_v12, %v42_v10 }
 0x572   :  { %v1203_v14 = vpop.eup %1202 }
 0x573   :  { %v365_v15 = vpack.c.bf16 %v1203_v14, %v1203_v14  ;;  %v476_v16 = vsel %vm475_vm8, %v474_v6, %v1203_v14  ;;  %v1407_v14 = vsel %vm109_vm4, %v45_v13, 0 }
 0x575   :  { %v367_v17 = vshrl.u32 %v365_v15, 16  ;;  %v997_v15 = vld [vmem:[%s1487_s1 + $0x3] ss:$0 sm:$0xff] }
 0x577   :  { %v369_v18 = vrot.slane %v367_v17, 2 }
 0x579   :  { %1114 = vmatmul.mubr.msk.bf16.vlgmr.msra.gmra.mrb[12].mxu1 %vm105_vm5, %v369_v18 }
 0x57a   :  { %1129 = vmatprep.mubr.msk.bf16.mxu1 %vm1230_vm2, %v1228_v0  ;;  %1126 = vmatpush3.bf16.msra.mxu1 %v38_v33 }
 0x57b   :  { %1127 = vmatprep.subr.bf16.mxu1 %v1228_v0 }
 0x57e   :  { %1128 = vmatpush3.bf16.msra.mxu1 %v522_v36 }
 0x57f   :  { %1141 = vmatprep.subr.bf16.mxu1 %v1228_v0 }
 0x64c   :  { %v407_v19 = vpop.f32.mrb[12].mxu1 }
 0x64d   :  { %v414_v20 = vrot.slane %v407_v19, 2  ;;  %v1115_v21 = vpop.f32.mrb[13].mxu1 }
 0x64e   :  { %v410_v22 = vpop.f32.mrb[14].mxu1 }
 0x64f   :  { %v416_v23 = vadd.f32 %v414_v20, %v1305_v24  ;;  %v1116_v25 = vpop.f32.mrb[15].mxu1 }
 0x651   :  { %1204 = vtanh.f32 %v416_v23 }
 0x65b   :  { %v1205_v26 = vpop.eup %1204 }
 0x65c   :  { %v418_v27 = vpack.c.bf16 %v1205_v26, %v1205_v26  ;;  %v478_v28 = vsel %vm477_vm9, %v476_v16, %v1205_v26 }
 0x65e   :  { %v420_v29 = vrot.slane %v418_v27, 3 }
 0x660   :  { %1122 = vmatmul.mubr.msk.bf16.vlgmr.msra.gmra.mrb[12].mxu0 %vm105_vm5, %v420_v29 }
 0x661   :  { %1137 = vmatprep.mubr.msk.bf16.mxu0 %vm1230_vm2, %v1228_v0  ;;  %1134 = vmatpush3.bf16.msra.mxu0 %v1398_v11 }
 0x662   :  { %1135 = vmatprep.subr.bf16.mxu0 %v1228_v0 }
 0x665   :  { %1136 = vmatpush3.bf16.msra.mxu0 %v1407_v14 }
 0x666   :  { %1149 = vmatprep.subr.bf16.mxu0 %v1228_v0 }
 0x733   :  { %v458_v37 = vpop.f32.mrb[12].mxu0 }
 0x734   :  { %v465_v38 = vrot.slane %v458_v37, 1  ;;  %v1123_v39 = vpop.f32.mrb[13].mxu0 }
 0x735   :  { %v461_v40 = vpop.f32.mrb[14].mxu0 }
 0x736   :  { %v467_v41 = vadd.f32 %v465_v38, %v1305_v24  ;;  %v1124_v42 = vpop.f32.mrb[15].mxu0 }
 0x738   :  { %1206 = vtanh.f32 %v467_v41 }
 0x742   :  { %v1207_v43 = vpop.eup %1206 }
 0x743   :  { %v479_v44 = vsel %vm109_vm4, %v478_v28, %v1207_v43 }
 0x744   :  { %v480_v45 = vsel %vm105_vm5, %v479_v44, 0.0 }
 0x745   :  { %v481_v46 = vrot.slane %v480_v45, 4 }
 0x747   :  { %v482_v47 = vadd.f32 %v481_v46, %v480_v45 }
 0x749   :  { %v483_v48 = vrot.slane %v482_v47, 2 }
 0x74b   :  { %v484_v49 = vadd.f32 %v483_v48, %v482_v47 }
 0x74d   :  { %v485_v50 = vrot.slane %v484_v49, 1 }
 0x74f   :  { %v486_v51 = vadd.f32 %v485_v50, %v484_v49 }
 0x751   :  { %v488_v52 = vmul.f32 0.125, %v486_v51 }
 0x753   :  { %v489_v53 = vsub.f32 %v479_v44, %v488_v52 }
 0x755   :  { %v490_v54 = vmul.f32 %v489_v53, %v489_v53 }
 0x757   :  { %v491_v55 = vsel %vm105_vm5, %v490_v54, 0.0 }
 0x758   :  { %v492_v56 = vrot.slane %v491_v55, 4 }
 0x75a   :  { %v493_v24 = vadd.f32 %v492_v56, %v491_v55 }
 0x75c   :  { %v494_v57 = vrot.slane %v493_v24, 2 }
 0x75e   :  { %v495_v58 = vadd.f32 %v494_v57, %v493_v24 }
 0x760   :  { %v496_v59 = vrot.slane %v495_v58, 1 }
 0x762   :  { %v497_v60 = vadd.f32 %v496_v59, %v495_v58 }
 0x764   :  { %v498_v61 = vmul.f32 0.125, %v497_v60 }
 0x766   :  { %v499_v62 = vadd.f32 1e-05, %v498_v61 }
 0x768   :  { %1208 = vrsqrt.f32 %v499_v62 }
 0x772   :  { %v1209_v63 = vpop.eup %1208 }
 0x773   :  { %v501_v2 = vmul.f32 %v1209_v63, %v489_v53 }
 0x775   :  { %v506_v4 = vmul.f32 %v995_v1, %v501_v2 }
 0x777   :  { %v511_v5 = vadd.f32 %v996_v3, %v506_v4 }
 0x779   :  { %v512_v6 = vmax.f32 %v511_v5, 0.0 }
 0x77b   :  { %v513_v7 = vpack.c.bf16 %v512_v6, %v512_v6 }
 0x77d   :  { %1130 = vmatmul.mubr.msk.bf16.vlgmr.msra.gmra.mrb[16].mxu1 %vm105_vm5, %v513_v7 }
 0x77e   :  { %1145 = vmatprep.mubr.msk.bf16.mxu1 %vm1230_vm2, %v1228_v0  ;;  %1142 = vmatpush3.bf16.msra.mxu1 %v1398_v11 }
 0x77f   :  { %1143 = vmatprep.subr.bf16.mxu1 %v1228_v0 }
 0x782   :  { %1144 = vmatpush3.bf16.msra.mxu1 %v1407_v14 }
 0x783   :  { %1157 = vmatprep.subr.bf16.mxu1 %v1228_v0 }
 0x850   :  { %v558_v16 = vpop.f32.mrb[16].mxu1 }
 0x851   :  { %v1417_v17 = vadd.f32 %v997_v15, %v558_v16  ;;  %v1131_v18 = vpop.f32.mrb[17].mxu1 }
 0x852   :  { %v561_v19 = vpop.f32.mrb[18].mxu1 }
 0x853   :  { %v1132_v20 = vpop.f32.mrb[19].mxu1  ;;  %1210 = vtanh.f32 %v1417_v17 }
 0x85d   :  { %v1211_v21 = vpop.eup %1210 }
 0x85e   :  { %v565_v22 = vpack.c.bf16 %v1211_v21, %v1211_v21 }
 0x860   :  { %1138 = vmatmul.mubr.msk.bf16.vlgmr.msra.gmra.mrb[16].mxu0 %vm105_vm5, %v565_v22 }
 0x861   :  { %1150 = vmatpush3.bf16.msra.mxu0 %v1398_v11  ;;  %1153 = vmatprep.mubr.msk.bf16.mxu0 %vm1230_vm2, %v1228_v0 }
 0x862   :  { %1151 = vmatprep.subr.bf16.mxu0 %v1228_v0 }
 0x865   :  { %1152 = vmatpush3.bf16.msra.mxu0 %v1407_v14 }
 0x866   :  { %1165 = vmatprep.subr.bf16.mxu0 %v1228_v0 }
 0x933   :  { %v606_v23 = vpop.f32.mrb[16].mxu0 }
 0x934   :  { %v613_v25 = vrot.slane %v606_v23, 7  ;;  %v1139_v26 = vpop.f32.mrb[17].mxu0 }
 0x935   :  { %v609_v27 = vpop.f32.mrb[18].mxu0 }
 0x936   :  { %v615_v28 = vadd.f32 %v613_v25, %v1417_v17  ;;  %v1140_v29 = vpop.f32.mrb[19].mxu0 }
 0x938   :  { %1212 = vtanh.f32 %v615_v28 }
 0x942   :  { %v1213_v30 = vpop.eup %1212 }
 0x943   :  { %v617_v31 = vpack.c.bf16 %v1213_v30, %v1213_v30  ;;  %v928_v40 = vsel %vm56_vm0, %v1211_v21, %v1213_v30 }
 0x945   :  { %v619_v32 = vshrl.u32 %v617_v31, 16 }
 0x947   :  { %1146 = vmatmul.mubr.msk.bf16.vlgmr.msra.gmra.mrb[20].mxu1 %vm105_vm5, %v619_v32 }
 0x948   :  { %1158 = vmatpush3.bf16.msra.mxu1 %v1398_v11  ;;  %1161 = vmatprep.mubr.msk.bf16.mxu1 %vm1230_vm2, %v1228_v0 }
 0x949   :  { %1159 = vmatprep.subr.bf16.mxu1 %v1228_v0 }
 0x94c   :  { %1160 = vmatpush3.bf16.msra.mxu1 %v1407_v14 }
 0x94d   :  { %1173 = vmatprep.subr.bf16.mxu1 %v1228_v0 }
 0xa1a   :  { %v658_v33 = vpop.f32.mrb[20].mxu1 }
 0xa1b   :  { %v665_v34 = vrot.slane %v658_v33, 6  ;;  %v1147_v35 = vpop.f32.mrb[21].mxu1 }
 0xa1c   :  { %v661_v36 = vpop.f32.mrb[22].mxu1 }
 0xa1d   :  { %v667_v37 = vadd.f32 %v665_v34, %v1417_v17  ;;  %v1148_v38 = vpop.f32.mrb[23].mxu1 }
 0xa1f   :  { %1214 = vtanh.f32 %v667_v37 }
 0xa29   :  { %v1215_v39 = vpop.eup %1214 }
 0xa2a   :  { %v669_v41 = vpack.c.bf16 %v1215_v39, %v1215_v39  ;;  %v929_v42 = vsel %vm57_vm1, %v928_v40, %v1215_v39 }
 0xa2c   :  { %v671_v43 = vrot.slane %v669_v41, 1 }
 0xa2e   :  { %1154 = vmatmul.mubr.msk.bf16.vlgmr.msra.gmra.mrb[20].mxu0 %vm105_vm5, %v671_v43 }
 0xa2f   :  { %1166 = vmatpush3.bf16.msra.mxu0 %v1398_v11  ;;  %1169 = vmatprep.mubr.msk.bf16.mxu0 %vm1230_vm2, %v1228_v0 }
 0xa30   :  { %1167 = vmatprep.subr.bf16.mxu0 %v1228_v0 }
 0xa33   :  { %1168 = vmatpush3.bf16.msra.mxu0 %v1407_v14 }
 0xa34   :  { %1181 = vmatprep.subr.bf16.mxu0 %v1228_v0 }
 0xb01   :  { %v709_v44 = vpop.f32.mrb[20].mxu0 }
 0xb02   :  { %v716_v45 = vrot.slane %v709_v44, 5  ;;  %v1155_v46 = vpop.f32.mrb[21].mxu0 }
 0xb03   :  { %v712_v47 = vpop.f32.mrb[22].mxu0 }
 0xb04   :  { %v718_v48 = vadd.f32 %v716_v45, %v1417_v17  ;;  %v1156_v49 = vpop.f32.mrb[23].mxu0 }
 0xb06   :  { %1216 = vtanh.f32 %v718_v48 }
 0xb10   :  { %v1217_v50 = vpop.eup %1216 }
 0xb11   :  { %v720_v51 = vpack.c.bf16 %v1217_v50, %v1217_v50  ;;  %v930_v52 = vsel %vm471_vm6, %v929_v42, %v1217_v50  ;;  %v1006_v50 = vld [vmem:[%s1487_s1 + $0x4] ss:$0 sm:$0xff] }
 0xb13   :  { %v722_v53 = vshrl.u32 %v720_v51, 16 }
 0xb15   :  { %v724_v54 = vrot.slane %v722_v53, 1 }
 0xb17   :  { %1162 = vmatmul.mubr.msk.bf16.vlgmr.msra.gmra.mrb[24].mxu1 %vm105_vm5, %v724_v54 }
 0xb18   :  { %1174 = vmatpush3.bf16.msra.mxu1 %v1398_v11  ;;  %1177 = vmatprep.mubr.msk.bf16.mxu1 %vm1230_vm2, %v1228_v0 }
 0xb19   :  { %1175 = vmatprep.subr.bf16.mxu1 %v1228_v0 }
 0xb1c   :  { %1176 = vmatpush3.bf16.msra.mxu1 %v1407_v14 }
 0xbea   :  { %v762_v55 = vpop.f32.mrb[24].mxu1 }
 0xbeb   :  { %v769_v56 = vrot.slane %v762_v55, 4  ;;  %v1163_v24 = vpop.f32.mrb[25].mxu1  ;;  %v1008_v55 = vld [vmem:[%s1487_s1 + $0x6] ss:$0 sm:$0xff] }
 0xbec   :  { %v765_v57 = vpop.f32.mrb[26].mxu1 }
 0xbed   :  { %v771_v58 = vadd.f32 %v769_v56, %v1417_v17  ;;  %v1164_v59 = vpop.f32.mrb[27].mxu1 }
 0xbef   :  { %1218 = vtanh.f32 %v771_v58  ;;  %v1009_v58 = vld [vmem:[%s1487_s1 + $0x7] ss:$0 sm:$0xff] }
 0xbf9   :  { %v1219_v60 = vpop.eup %1218 }
 0xbfa   :  { %v773_v61 = vpack.c.bf16 %v1219_v60, %v1219_v60  ;;  %v931_v62 = vsel %vm473_vm7, %v930_v52, %v1219_v60  ;;  %v1007_v52 = vld [vmem:[%s1487_s1 + $0x5] ss:$0 sm:$0xff] }
 0xbfc   :  { %v775_v63 = vrot.slane %v773_v61, 2 }
 0xbfe   :  { %1170 = vmatmul.mubr.msk.bf16.vlgmr.msra.gmra.mrb[24].mxu0 %vm105_vm5, %v775_v63 }
 0xbff   :  { %1182 = vmatpush3.bf16.msra.mxu0 %v1398_v11  ;;  %1185 = vmatprep.mubr.msk.bf16.mxu0 %vm1230_vm2, %v1228_v0 }
 0xc00   :  { %1183 = vmatprep.subr.bf16.mxu0 %v1228_v0 }
 0xc03   :  { %1184 = vmatpush3.bf16.msra.mxu0 %v1407_v14 }
 0xcd1   :  { %v813_v1 = vpop.f32.mrb[24].mxu0 }
 0xcd2   :  { %v820_v2 = vrot.slane %v813_v1, 3  ;;  %v1171_v3 = vpop.f32.mrb[25].mxu0 }
 0xcd3   :  { %v816_v4 = vpop.f32.mrb[26].mxu0 }
 0xcd4   :  { %v822_v5 = vadd.f32 %v820_v2, %v1417_v17  ;;  %v1172_v6 = vpop.f32.mrb[27].mxu0 }
 0xcd6   :  { %1220 = vtanh.f32 %v822_v5 }
 0xce0   :  { %v1221_v7 = vpop.eup %1220 }
 0xce1   :  { %v824_v8 = vpack.c.bf16 %v1221_v7, %v1221_v7  ;;  %v932_v9 = vsel %vm475_vm8, %v931_v62, %v1221_v7 }
 0xce3   :  { %v826_v10 = vshrl.u32 %v824_v8, 16 }
 0xce5   :  { %v828_v11 = vrot.slane %v826_v10, 2 }
 0xce7   :  { %1178 = vmatmul.mubr.msk.bf16.vlgmr.msra.gmra.mrb[28].mxu1 %vm105_vm5, %v828_v11 }
 0xdba   :  { %v866_v12 = vpop.f32.mrb[28].mxu1 }
 0xdbb   :  { %v873_v0 = vrot.slane %v866_v12, 2  ;;  %v1179_v13 = vpop.f32.mrb[29].mxu1 }
 0xdbc   :  { %v869_v14 = vpop.f32.mrb[30].mxu1 }
 0xdbd   :  { %v875_v15 = vadd.f32 %v873_v0, %v1417_v17  ;;  %v1180_v16 = vpop.f32.mrb[31].mxu1 }
 0xdbf   :  { %1222 = vtanh.f32 %v875_v15 }
 0xdc9   :  { %v1223_v18 = vpop.eup %1222 }
 0xdca   :  { %v877_v19 = vpack.c.bf16 %v1223_v18, %v1223_v18  ;;  %v933_v20 = vsel %vm477_vm9, %v932_v9, %v1223_v18 }
 0xdcc   :  { %v879_v21 = vrot.slane %v877_v19, 3 }
 0xdce   :  { %1186 = vmatmul.mubr.msk.bf16.vlgmr.msra.gmra.mrb[28].mxu0 %vm105_vm5, %v879_v21 }
 0xea1   :  { %v917_v22 = vpop.f32.mrb[28].mxu0 }
 0xea2   :  { %v924_v23 = vrot.slane %v917_v22, 1  ;;  %v1187_v25 = vpop.f32.mrb[29].mxu0 }
 0xea3   :  { %v920_v26 = vpop.f32.mrb[30].mxu0 }
 0xea4   :  { %v926_v27 = vadd.f32 %v924_v23, %v1417_v17  ;;  %v1188_v28 = vpop.f32.mrb[31].mxu0 }
 0xea6   :  { %1224 = vtanh.f32 %v926_v27 }
 0xeb0   :  { %v1225_v29 = vpop.eup %1224 }
 0xeb1   :  { %v934_v30 = vsel %vm109_vm4, %v933_v20, %v1225_v29 }
 0xeb2   :  { %v935_v31 = vsel %vm105_vm5, %v934_v30, 0.0 }
 0xeb3   :  { %v936_v32 = vrot.slane %v935_v31, 4 }
 0xeb5   :  { %v937_v33 = vadd.f32 %v936_v32, %v935_v31 }
 0xeb7   :  { %v938_v34 = vrot.slane %v937_v33, 2 }
 0xeb9   :  { %v939_v35 = vadd.f32 %v938_v34, %v937_v33 }
 0xebb   :  { %v940_v36 = vrot.slane %v939_v35, 1 }
 0xebd   :  { %v941_v37 = vadd.f32 %v940_v36, %v939_v35 }
 0xebf   :  { %v942_v38 = vmul.f32 0.125, %v941_v37 }
 0xec1   :  { %v943_v39 = vsub.f32 %v934_v30, %v942_v38 }
 0xec3   :  { %v944_v40 = vmul.f32 %v943_v39, %v943_v39 }
 0xec5   :  { %v945_v41 = vsel %vm105_vm5, %v944_v40, 0.0 }
 0xec6   :  { %v946_v42 = vrot.slane %v945_v41, 4 }
 0xec8   :  { %v947_v17 = vadd.f32 %v946_v42, %v945_v41 }
 0xeca   :  { %v948_v43 = vrot.slane %v947_v17, 2 }
 0xecc   :  { %v949_v44 = vadd.f32 %v948_v43, %v947_v17 }
 0xece   :  { %v950_v45 = vrot.slane %v949_v44, 1 }
 0xed0   :  { %v951_v46 = vadd.f32 %v950_v45, %v949_v44 }
 0xed2   :  { %v952_v47 = vmul.f32 0.125, %v951_v46 }
 0xed4   :  { %v953_v48 = vadd.f32 1e-05, %v952_v47 }
 0xed6   :  { %1226 = vrsqrt.f32 %v953_v48 }
 0xee0   :  { %v1227_v49 = vpop.eup %1226 }
 0xee1   :  { %v955_v51 = vmul.f32 %v1227_v49, %v943_v39 }
 0xee3   :  { %v960_v53 = vmul.f32 %v1006_v50, %v955_v51 }
 0xee5   :  { %v965_v54 = vadd.f32 %v1007_v52, %v960_v53 }
 0xee7   :  { %v966_v56 = vmax.f32 %v965_v54, 0.0 }
 0xee9   :  { %v971_v24 = vmul.f32 %v1008_v55, %v966_v56 }
 0xeeb   :  { %v972_v57 = vsel %vm105_vm5, %v971_v24, 0.0 }
 0xeec   :  { %973 = vadd.xlane.f32.xlu0 %v972_v57 }
 0xf79   :  { %v974_v59 = vpop.xlane.xlu0 %973 }
 0xf7a   :  { %v979_v60 = vadd.f32 %v1009_v58, %v974_v59 }
 0xf7c   :  { %981 = vst.msk [vmem:[%s1489_s2] sm:$0xff] %vm980_vm10, %v979_v60 }

</bundles_post_ra>
